<compile_context>
chip_gen: v6e
topology: v6e:2x2x1
jax: 0.10.0
libtpu: 0.0.40
codegen_flags: <defaults>
</compile_context>

<pallas_src>
import functools

import jax
import jax.numpy as jnp
from jax import lax
from jax.experimental import pallas as pl
from jax.experimental.pallas import tpu as pltpu


def _sab_kernel(w_ref, x_ref, o_ref, *, ksize, C, H, W):
    # w_ref: SMEM, flat (2*k*k,) float32.  First k*k entries are the avg-channel
    #        weights already divided by C; the last k*k are the max-channel ones.
    # x_ref: VMEM block (Bt, C, H*W)   (lane-dense last dim)
    # o_ref: VMEM block (Bt, 1, H*W)
    Bt = x_ref.shape[0]
    HW = H * W
    p = (ksize - 1) // 2
    pmax = p * W + p                 # largest |flat shift| of any conv tap
    PW = HW + 2 * pmax               # padded flat width
    k2 = ksize * ksize

    # Channel reduction, vectorized over the Bt images in this block.
    x = x_ref[...].astype(jnp.float32)          # (Bt, C, HW)
    csum = jnp.sum(x, axis=1)                   # (Bt, HW)  sum, not mean
    cmax = jnp.max(x, axis=1)                   # (Bt, HW)

    # One flat zero-padded buffer per feature, built once and reused by every tap.
    zpad = jnp.zeros((Bt, pmax), jnp.float32)
    sum_pad = jnp.concatenate([zpad, csum, zpad], axis=-1)   # (Bt, PW)
    max_pad = jnp.concatenate([zpad, cmax, zpad], axis=-1)   # (Bt, PW)

    # Column of the *source* pixel that each padded-buffer slot holds
    # (value on the zero-pad slots is irrelevant: the data there is 0).
    idx = lax.broadcasted_iota(jnp.int32, (Bt, PW), 1)
    col_src = (idx + ((-p) % W)) % W            # == (idx - pmax) mod W on data slots

    # Pre-masked source buffers, one per column offset b.
    #   b > 0: a shifted read wraps onto the next row exactly where col_src < b.
    #   b < 0: it wraps onto the previous row exactly where col_src >= W + b.
    # Zeroing those columns once per b makes every tap mask-free.
    # Row out-of-range taps need no mask at all: when the column is valid, the
    # flat index of a row-out-of-range tap always lands inside the pmax zero pads.
    def masked(buf, b):
        if b == 0:
            return buf
        keep = (col_src >= b) if b > 0 else (col_src < W + b)
        return jnp.where(keep, buf, 0.0)

    sum_b = {b: masked(sum_pad, b) for b in range(-p, p + 1)}
    max_b = {b: masked(max_pad, b) for b in range(-p, p + 1)}

    # Fully unrolled k*k conv: each tap = static lane-offset slice (XLU) +
    # two scalar*vector multiply-adds (VALU).  No per-tap selects.
    acc = jnp.zeros((Bt, HW), jnp.float32)
    for a in range(-p, p + 1):
        base = pmax + a * W
        for b in range(-p, p + 1):
            off = base + b
            wa = w_ref[(a + p) * ksize + (b + p)]        # avg weight (already / C)
            wm = w_ref[k2 + (a + p) * ksize + (b + p)]   # max weight
            acc = (acc
                   + wa * sum_b[b][:, off:off + HW]
                   + wm * max_b[b][:, off:off + HW])

    o_ref[...] = jax.nn.sigmoid(acc)[:, None, :].astype(o_ref.dtype)


def _choose_batch_tile(N, C, H, W, ksize, itemsize, target_bytes=4 * 1024 * 1024):
    """Largest divisor of N whose per-step VMEM working set stays under target_bytes."""
    p = (ksize - 1) // 2
    HW = H * W
    PW = HW + 2 * (p * W + p)
    # input block + 2*(2p+1) padded/masked f32 buffers + a few (HW,) f32 temps
    per_image = C * HW * itemsize + 2 * (2 * p + 1) * PW * 4 + 4 * HW * 4
    bt = max(1, min(N, target_bytes // max(1, per_image)))
    while N % bt:
        bt -= 1
    return bt


def sab_forward(x, conv_weight, kernel_size=3):
    """x: (N, C, H, W); conv_weight: (1, 2, k, k) (PyTorch OIHW). Returns (N, 1, H, W)."""
    N, C, H, W = x.shape
    k = kernel_size
    assert k % 2 == 1, "SAB uses odd kernel sizes (3 or 7)"
    HW = H * W

    # Fold the channel mean into the weights: conv_w(mean) == conv_{w/C}(sum).
    scale = jnp.array([1.0 / C, 1.0], jnp.float32).reshape(2, 1, 1)
    w_flat = (conv_weight[0].astype(jnp.float32) * scale).reshape(-1)   # (2*k*k,)

    # Lane-dense layout: flatten spatial so the last dim is H*W, not W.
    x3 = x.reshape(N, C, HW)

    bt = _choose_batch_tile(N, C, H, W, k, jnp.dtype(x.dtype).itemsize)
    grid = (N // bt,)

    kernel = functools.partial(_sab_kernel, ksize=k, C=C, H=H, W=W)
    out3 = pl.pallas_call(
        kernel,
        out_shape=jax.ShapeDtypeStruct((N, 1, HW), x.dtype),
        grid=grid,
        in_specs=[
            pl.BlockSpec(memory_space=pltpu.MemorySpace.SMEM),       # weights
            pl.BlockSpec((bt, C, HW), lambda n: (n, 0, 0)),          # x
        ],
        out_specs=pl.BlockSpec((bt, 1, HW), lambda n: (n, 0, 0)),
        compiler_params=pltpu.CompilerParams(
            dimension_semantics=("parallel",)),
    )(w_flat, x3)
    return out3.reshape(N, 1, H, W)


def sab_reference(x, conv_weight, kernel_size=3):
    """Pure-JAX reference matching the PyTorch forward exactly."""
    avg = jnp.mean(x, axis=1, keepdims=True)
    mx = jnp.max(x, axis=1, keepdims=True)
    feat = jnp.concatenate([avg, mx], axis=1)
    pad = (kernel_size - 1) // 2
    out = lax.conv_general_dilated(
        feat, conv_weight, window_strides=(1, 1),
        padding=((pad, pad), (pad, pad)),
        dimension_numbers=("NCHW", "OIHW", "NCHW"))
    return jax.nn.sigmoid(out)


if __name__ == "__main__":
    key = jax.random.PRNGKey(0)
    kx, kw3, kw7 = jax.random.split(key, 3)

    N, C, H, W = 2, 4, 16, 16
    x = jax.random.normal(kx, (N, C, H, W), dtype=jnp.float32)

    for k, kw in ((3, kw3), (7, kw7)):
        # Deterministic init mimicking nn.Conv2d default (uniform +/- 1/sqrt(fan_in)).
        fan_in = 2 * k * k
        bound = 1.0 / (fan_in ** 0.5)
        conv_w = jax.random.uniform(kw, (1, 2, k, k), jnp.float32, -bound, bound)

        out = jax.block_until_ready(sab_forward(x, conv_w, kernel_size=k))
        ref = sab_reference(x, conv_w, kernel_size=k)
        assert out.shape == (N, 1, H, W), out.shape
        assert jnp.allclose(out, ref, atol=1e-5, rtol=1e-5), f"mismatch vs reference (k={k})"

    print("KERNEL_OK")
</pallas_src>

<mosaic_0001>
module attributes {stable_mosaic.version = 11 : i64} {
  func.func @_sab_kernel(%arg0: i32, %arg1: memref<18xf32, #tpu.memory_space<smem>>, %arg2: memref<2x4x256xf32, #tpu.memory_space<vmem>>, %arg3: memref<2x1x256xf32, #tpu.memory_space<vmem>>) attributes {dimension_semantics = [#tpu.dimension_semantics<parallel>], iteration_bounds = array<i64: 1>, scalar_prefetch = 0 : i64, scratch_operands = 0 : i64, tpu.core_type = #tpu.core_type<tc>, window_params = [{transform_indices = @transform_0, window_bounds = array<i64: 18>}, {transform_indices = @transform_1, window_bounds = array<i64: 2, 4, 256>}, {transform_indices = @transform_2, window_bounds = array<i64: 2, 1, 256>}]} {
    %c0 = arith.constant 0 : index
    %c0_0 = arith.constant 0 : index
    %c0_1 = arith.constant 0 : index
    %0 = vector.load %arg2[%c0, %c0_0, %c0_1] : memref<2x4x256xf32, #tpu.memory_space<vmem>>, vector<2x4x256xf32>
    %cst = arith.constant dense<0.000000e+00> : vector<2x256xf32>
    %1 = vector.multi_reduction <add>, %0, %cst [1] : vector<2x4x256xf32> to vector<2x256xf32>
    %cst_2 = arith.constant dense<0xFF800000> : vector<2x256xf32>
    %2 = vector.multi_reduction <maximumf>, %0, %cst_2 [1] : vector<2x4x256xf32> to vector<2x256xf32>
    %cst_3 = arith.constant 0.000000e+00 : f32
    %3 = vector.broadcast %cst_3 : f32 to vector<2x17xf32>
    %4 = tpu.concatenate %3, %1, %3 in 1 : vector<2x17xf32>, vector<2x256xf32>, vector<2x17xf32> -> vector<2x290xf32>
    %5 = tpu.concatenate %3, %2, %3 in 1 : vector<2x17xf32>, vector<2x256xf32>, vector<2x17xf32> -> vector<2x290xf32>
    %6 = tpu.iota {dimensions = array<i32: 1>} : vector<2x290xi32>
    %c15_i32 = arith.constant 15 : i32
    %7 = vector.broadcast %c15_i32 : i32 to vector<2x290xi32>
    %8 = arith.addi %6, %7 : vector<2x290xi32>
    %c16_i32 = arith.constant 16 : i32
    %c0_i32 = arith.constant 0 : i32
    %9 = arith.cmpi eq, %c16_i32, %c0_i32 : i32
    %c1_i32 = arith.constant 1 : i32
    %10 = arith.select %9, %c1_i32, %c16_i32 : i32
    %11 = vector.broadcast %10 : i32 to vector<2x290xi32>
    %12 = arith.remsi %8, %11 : vector<2x290xi32>
    %c0_i32_4 = arith.constant 0 : i32
    %13 = vector.broadcast %c0_i32_4 : i32 to vector<2x290xi32>
    %14 = arith.cmpi ne, %12, %13 : vector<2x290xi32>
    %c0_i32_5 = arith.constant 0 : i32
    %15 = vector.broadcast %c0_i32_5 : i32 to vector<2x290xi32>
    %16 = arith.cmpi slt, %12, %15 : vector<2x290xi32>
    %c0_i32_6 = arith.constant 0 : i32
    %17 = arith.cmpi slt, %10, %c0_i32_6 : i32
    %18 = vector.broadcast %17 : i1 to vector<2x290xi1>
    %19 = vector.broadcast %18 : vector<2x290xi1> to vector<2x290xi1>
    %20 = arith.xori %16, %19 : vector<2x290xi1>
    %21 = arith.andi %20, %14 : vector<2x290xi1>
    %22 = vector.broadcast %10 : i32 to vector<2x290xi32>
    %23 = arith.addi %12, %22 : vector<2x290xi32>
    %24 = arith.select %21, %23, %12 : vector<2x290xi1>, vector<2x290xi32>
    %c15_i32_7 = arith.constant 15 : i32
    %25 = vector.broadcast %c15_i32_7 : i32 to vector<2x290xi32>
    %26 = arith.cmpi slt, %24, %25 : vector<2x290xi32>
    %cst_8 = arith.constant 0.000000e+00 : f32
    %27 = vector.broadcast %cst_8 : f32 to vector<2x290xf32>
    %28 = arith.select %26, %4, %27 : vector<2x290xi1>, vector<2x290xf32>
    %c1_i32_9 = arith.constant 1 : i32
    %29 = vector.broadcast %c1_i32_9 : i32 to vector<2x290xi32>
    %30 = arith.cmpi sge, %24, %29 : vector<2x290xi32>
    %cst_10 = arith.constant 0.000000e+00 : f32
    %31 = vector.broadcast %cst_10 : f32 to vector<2x290xf32>
    %32 = arith.select %30, %4, %31 : vector<2x290xi1>, vector<2x290xf32>
    %c15_i32_11 = arith.constant 15 : i32
    %33 = vector.broadcast %c15_i32_11 : i32 to vector<2x290xi32>
    %34 = arith.cmpi slt, %24, %33 : vector<2x290xi32>
    %cst_12 = arith.constant 0.000000e+00 : f32
    %35 = vector.broadcast %cst_12 : f32 to vector<2x290xf32>
    %36 = arith.select %34, %5, %35 : vector<2x290xi1>, vector<2x290xf32>
    %c1_i32_13 = arith.constant 1 : i32
    %37 = vector.broadcast %c1_i32_13 : i32 to vector<2x290xi32>
    %38 = arith.cmpi sge, %24, %37 : vector<2x290xi32>
    %cst_14 = arith.constant 0.000000e+00 : f32
    %39 = vector.broadcast %cst_14 : f32 to vector<2x290xf32>
    %40 = arith.select %38, %5, %39 : vector<2x290xi1>, vector<2x290xf32>
    %cst_15 = arith.constant 0.000000e+00 : f32
    %41 = vector.broadcast %cst_15 : f32 to vector<2x256xf32>
    %c0_16 = arith.constant 0 : index
    %42 = memref.load %arg1[%c0_16] : memref<18xf32, #tpu.memory_space<smem>>
    %c9 = arith.constant 9 : index
    %43 = memref.load %arg1[%c9] : memref<18xf32, #tpu.memory_space<smem>>
    %44 = vector.extract_strided_slice %28 {offsets = [0, 0], sizes = [2, 256], strides = [1, 1]} : vector<2x290xf32> to vector<2x256xf32>
    %45 = vector.broadcast %42 : f32 to vector<2x256xf32>
    %46 = arith.mulf %45, %44 : vector<2x256xf32>
    %47 = arith.addf %41, %46 : vector<2x256xf32>
    %48 = vector.extract_strided_slice %36 {offsets = [0, 0], sizes = [2, 256], strides = [1, 1]} : vector<2x290xf32> to vector<2x256xf32>
    %49 = vector.broadcast %43 : f32 to vector<2x256xf32>
    %50 = arith.mulf %49, %48 : vector<2x256xf32>
    %51 = arith.addf %47, %50 : vector<2x256xf32>
    %c1 = arith.constant 1 : index
    %52 = memref.load %arg1[%c1] : memref<18xf32, #tpu.memory_space<smem>>
    %c10 = arith.constant 10 : index
    %53 = memref.load %arg1[%c10] : memref<18xf32, #tpu.memory_space<smem>>
    %54 = vector.extract_strided_slice %4 {offsets = [0, 1], sizes = [2, 256], strides = [1, 1]} : vector<2x290xf32> to vector<2x256xf32>
    %55 = vector.broadcast %52 : f32 to vector<2x256xf32>
    %56 = arith.mulf %55, %54 : vector<2x256xf32>
    %57 = arith.addf %51, %56 : vector<2x256xf32>
    %58 = vector.extract_strided_slice %5 {offsets = [0, 1], sizes = [2, 256], strides = [1, 1]} : vector<2x290xf32> to vector<2x256xf32>
    %59 = vector.broadcast %53 : f32 to vector<2x256xf32>
    %60 = arith.mulf %59, %58 : vector<2x256xf32>
    %61 = arith.addf %57, %60 : vector<2x256xf32>
    %c2 = arith.constant 2 : index
    %62 = memref.load %arg1[%c2] : memref<18xf32, #tpu.memory_space<smem>>
    %c11 = arith.constant 11 : index
    %63 = memref.load %arg1[%c11] : memref<18xf32, #tpu.memory_space<smem>>
    %64 = vector.extract_strided_slice %32 {offsets = [0, 2], sizes = [2, 256], strides = [1, 1]} : vector<2x290xf32> to vector<2x256xf32>
    %65 = vector.broadcast %62 : f32 to vector<2x256xf32>
    %66 = arith.mulf %65, %64 : vector<2x256xf32>
    %67 = arith.addf %61, %66 : vector<2x256xf32>
    %68 = vector.extract_strided_slice %40 {offsets = [0, 2], sizes = [2, 256], strides = [1, 1]} : vector<2x290xf32> to vector<2x256xf32>
    %69 = vector.broadcast %63 : f32 to vector<2x256xf32>
    %70 = arith.mulf %69, %68 : vector<2x256xf32>
    %71 = arith.addf %67, %70 : vector<2x256xf32>
    %c3 = arith.constant 3 : index
    %72 = memref.load %arg1[%c3] : memref<18xf32, #tpu.memory_space<smem>>
    %c12 = arith.constant 12 : index
    %73 = memref.load %arg1[%c12] : memref<18xf32, #tpu.memory_space<smem>>
    %74 = vector.extract_strided_slice %28 {offsets = [0, 16], sizes = [2, 256], strides = [1, 1]} : vector<2x290xf32> to vector<2x256xf32>
    %75 = vector.broadcast %72 : f32 to vector<2x256xf32>
    %76 = arith.mulf %75, %74 : vector<2x256xf32>
    %77 = arith.addf %71, %76 : vector<2x256xf32>
    %78 = vector.extract_strided_slice %36 {offsets = [0, 16], sizes = [2, 256], strides = [1, 1]} : vector<2x290xf32> to vector<2x256xf32>
    %79 = vector.broadcast %73 : f32 to vector<2x256xf32>
    %80 = arith.mulf %79, %78 : vector<2x256xf32>
    %81 = arith.addf %77, %80 : vector<2x256xf32>
    %c4 = arith.constant 4 : index
    %82 = memref.load %arg1[%c4] : memref<18xf32, #tpu.memory_space<smem>>
    %c13 = arith.constant 13 : index
    %83 = memref.load %arg1[%c13] : memref<18xf32, #tpu.memory_space<smem>>
    %84 = vector.extract_strided_slice %4 {offsets = [0, 17], sizes = [2, 256], strides = [1, 1]} : vector<2x290xf32> to vector<2x256xf32>
    %85 = vector.broadcast %82 : f32 to vector<2x256xf32>
    %86 = arith.mulf %85, %84 : vector<2x256xf32>
    %87 = arith.addf %81, %86 : vector<2x256xf32>
    %88 = vector.extract_strided_slice %5 {offsets = [0, 17], sizes = [2, 256], strides = [1, 1]} : vector<2x290xf32> to vector<2x256xf32>
    %89 = vector.broadcast %83 : f32 to vector<2x256xf32>
    %90 = arith.mulf %89, %88 : vector<2x256xf32>
    %91 = arith.addf %87, %90 : vector<2x256xf32>
    %c5 = arith.constant 5 : index
    %92 = memref.load %arg1[%c5] : memref<18xf32, #tpu.memory_space<smem>>
    %c14 = arith.constant 14 : index
    %93 = memref.load %arg1[%c14] : memref<18xf32, #tpu.memory_space<smem>>
    %94 = vector.extract_strided_slice %32 {offsets = [0, 18], sizes = [2, 256], strides = [1, 1]} : vector<2x290xf32> to vector<2x256xf32>
    %95 = vector.broadcast %92 : f32 to vector<2x256xf32>
    %96 = arith.mulf %95, %94 : vector<2x256xf32>
    %97 = arith.addf %91, %96 : vector<2x256xf32>
    %98 = vector.extract_strided_slice %40 {offsets = [0, 18], sizes = [2, 256], strides = [1, 1]} : vector<2x290xf32> to vector<2x256xf32>
    %99 = vector.broadcast %93 : f32 to vector<2x256xf32>
    %100 = arith.mulf %99, %98 : vector<2x256xf32>
    %101 = arith.addf %97, %100 : vector<2x256xf32>
    %c6 = arith.constant 6 : index
    %102 = memref.load %arg1[%c6] : memref<18xf32, #tpu.memory_space<smem>>
    %c15 = arith.constant 15 : index
    %103 = memref.load %arg1[%c15] : memref<18xf32, #tpu.memory_space<smem>>
    %104 = vector.extract_strided_slice %28 {offsets = [0, 32], sizes = [2, 256], strides = [1, 1]} : vector<2x290xf32> to vector<2x256xf32>
    %105 = vector.broadcast %102 : f32 to vector<2x256xf32>
    %106 = arith.mulf %105, %104 : vector<2x256xf32>
    %107 = arith.addf %101, %106 : vector<2x256xf32>
    %108 = vector.extract_strided_slice %36 {offsets = [0, 32], sizes = [2, 256], strides = [1, 1]} : vector<2x290xf32> to vector<2x256xf32>
    %109 = vector.broadcast %103 : f32 to vector<2x256xf32>
    %110 = arith.mulf %109, %108 : vector<2x256xf32>
    %111 = arith.addf %107, %110 : vector<2x256xf32>
    %c7 = arith.constant 7 : index
    %112 = memref.load %arg1[%c7] : memref<18xf32, #tpu.memory_space<smem>>
    %c16 = arith.constant 16 : index
    %113 = memref.load %arg1[%c16] : memref<18xf32, #tpu.memory_space<smem>>
    %114 = vector.extract_strided_slice %4 {offsets = [0, 33], sizes = [2, 256], strides = [1, 1]} : vector<2x290xf32> to vector<2x256xf32>
    %115 = vector.broadcast %112 : f32 to vector<2x256xf32>
    %116 = arith.mulf %115, %114 : vector<2x256xf32>
    %117 = arith.addf %111, %116 : vector<2x256xf32>
    %118 = vector.extract_strided_slice %5 {offsets = [0, 33], sizes = [2, 256], strides = [1, 1]} : vector<2x290xf32> to vector<2x256xf32>
    %119 = vector.broadcast %113 : f32 to vector<2x256xf32>
    %120 = arith.mulf %119, %118 : vector<2x256xf32>
    %121 = arith.addf %117, %120 : vector<2x256xf32>
    %c8 = arith.constant 8 : index
    %122 = memref.load %arg1[%c8] : memref<18xf32, #tpu.memory_space<smem>>
    %c17 = arith.constant 17 : index
    %123 = memref.load %arg1[%c17] : memref<18xf32, #tpu.memory_space<smem>>
    %124 = vector.extract_strided_slice %32 {offsets = [0, 34], sizes = [2, 256], strides = [1, 1]} : vector<2x290xf32> to vector<2x256xf32>
    %125 = vector.broadcast %122 : f32 to vector<2x256xf32>
    %126 = arith.mulf %125, %124 : vector<2x256xf32>
    %127 = arith.addf %121, %126 : vector<2x256xf32>
    %128 = vector.extract_strided_slice %40 {offsets = [0, 34], sizes = [2, 256], strides = [1, 1]} : vector<2x290xf32> to vector<2x256xf32>
    %129 = vector.broadcast %123 : f32 to vector<2x256xf32>
    %130 = arith.mulf %129, %128 : vector<2x256xf32>
    %131 = arith.addf %127, %130 : vector<2x256xf32>
    %132 = arith.negf %131 : vector<2x256xf32>
    %133 = math.exp %132 : vector<2x256xf32>
    %cst_17 = arith.constant 1.000000e+00 : f32
    %134 = vector.broadcast %cst_17 : f32 to vector<2x256xf32>
    %135 = arith.addf %134, %133 : vector<2x256xf32>
    %136 = arith.divf %134, %135 : vector<2x256xf32>
    %137 = vector.shape_cast %136 : vector<2x256xf32> to vector<2x1x256xf32>
    %c0_18 = arith.constant 0 : index
    %c0_19 = arith.constant 0 : index
    %c0_20 = arith.constant 0 : index
    %138 = vector.load %arg3[%c0_18, %c0_19, %c0_20] : memref<2x1x256xf32, #tpu.memory_space<vmem>>, vector<2x1x256xf32>
    tpu.vector_store %arg3[%c0_18, %c0_19, %c0_20], %137 {strides = array<i32>} : memref<2x1x256xf32, #tpu.memory_space<vmem>>, vector<2x1x256xf32>,
    return
  }
  func.func @transform_0(%arg0: i32) -> i32 {
    %c0_i32 = arith.constant 0 : i32
    %c0_i32_0 = arith.constant 0 : i32
    return %c0_i32 : i32
  }
  func.func @transform_1(%arg0: i32) -> (i32, i32, i32) {
    %c0_i32 = arith.constant 0 : i32
    %c0_i32_0 = arith.constant 0 : i32
    %c0_i32_1 = arith.constant 0 : i32
    return %arg0, %c0_i32, %c0_i32_0 : i32, i32, i32
  }
  func.func @transform_2(%arg0: i32) -> (i32, i32, i32) {
    %c0_i32 = arith.constant 0 : i32
    %c0_i32_0 = arith.constant 0 : i32
    %c0_i32_1 = arith.constant 0 : i32
    return %arg0, %c0_i32, %c0_i32_0 : i32, i32, i32
  }
}

</mosaic_0001>

<bundles_post_ra>
// kernel: tpu_custom_call.1
= control target key start
LH: loop header
LB: loop body
LE: loop exit
PB: predicated region body
PF: predicated region fallthrough
CT: control target
= control target key end

     0   :  { %7 = vsyncpa [#allocation5], 0  ;;  %s1008_s0 = inlined_call_operand.hbm [shape: f32[18], index: 0, kind: input, shape index: {}]   ;;  %s1009_s1 = inlined_call_operand.hbm [shape: f32[2,4,256], index: 1, kind: input, shape index: {}]   ;;  %s1010_s2 = inlined_call_operand.hbm [shape: f32[2,1,256], index: 2, kind: output, shape index: {}]  }
   0x1   :  { %8 = vsyncpa [#allocation3], 0 }
   0x2   :  { %9 = vsyncpa [#allocation4], 0  ;;  %s700_s9 = smov [#allocation2]   ;;  %s701_s12 = smov [#allocation6]  }
   0x3   :  { %17 = dma.hbm_to_smem %s1008_s0, 16, %s700_s9, [#allocation5]  }
   0x4   :  { %s23_s13 = sshll.u32 %s701_s12, 4  ;;  %s24_s13 = int_to_ptr.vmem [resolvable:$true] %s23_s13 }
   0x5   :  { %s662_s14 = scalar_lea.vmem %s24_s13, 256  ;;  %p667_p1 = scmp.lt.s32.totalorder %s24_s13, %s24_s13 }
   0x6   :  { %p663_p0 = scmp.ne.s32.totalorder %s24_s13, %s662_s14  ;;  %p668_p2 = scmp.lt.s32.totalorder %s662_s14, %s662_s14 }
   0x8   :  { %p669_p3 = por %p668_p2, %p667_p1 }
   0xa   :  { %p670_p4 = pnand %p669_p3, %p663_p0 }
   0xc   :  { %673 = shalt.err (!%p670_p4)
}
   0xd   :  { %s702_s15 = smov 128   ;;  %s703_s16 = smov 8  }
   0xe   :  { %29 = dma.hbm_to_vmem [thread:$0]  %s1009_s1, 256, %s24_s13, [#allocation3], %s702_s15, %s702_s15, %s703_s16  }
   0xf   :  { %694 = dma.done.wait [#allocation5], 16  }
  0x10   :  { %695 = vsyncadd [#allocation5], 4294967280 }
  0x11   :  { %696 = dma.done.wait [#allocation3], 256  }
  0x12   :  { %697 = vsyncadd [#allocation3], 4294967040 }
  0x13   :  { %36 = sfence }
  0x14   :  { %v37_v0 = vld [vmem:[#allocation6] sm:$0xff]  ;;  %v38_v1 = vld [vmem:[#allocation6 + $0x8] sm:$0xff]  ;;  %vm45_vm0 = vcmask 1043456   ;;  %vm106_vm1 = vcmask 1041409   ;;  %s704_s0 = smov 17   ;;  %s602_s1 = sld [smem:[#allocation2 + $0xa]] }
  0x15   :  { %v74_v2 = vsel %vm45_vm0, %v37_v0, -inf  ;;  %v88_v3 = vsel %vm45_vm0, %v38_v1, -inf  ;;  %v46_v4 = vsel %vm45_vm0, %v37_v0, 0.0  ;;  %v60_v5 = vsel %vm45_vm0, %v38_v1, 0.0  ;;  %s601_s19 = sld [smem:[#allocation2 + $0x1]]  ;;  %s705_s26 = smov 127  }
  0x16   :  { %v75_v6 = vrot.slane %v74_v2, 4  ;;  %v89_v7 = vrot.slane %v88_v3, 4  ;;  %v47_v8 = vrot.slane %v46_v4, 4  ;;  %v61_v9 = vrot.slane %v60_v5, 4  ;;  %s608_s20 = sld [smem:[#allocation2 + $0xd]]  ;;  %s706_s3 = smov 111  }
  0x17   :  { %v41_v10 = vcombine.high %v37_v0, %v37_v0  ;;  %v42_v11 = vcombine.high %v38_v1, %v38_v1  ;;  %v136_v0 = vlaneseq  ;;  %s607_s21 = sld [smem:[#allocation2 + $0x4]]  ;;  %vm113_vm2 = vcmask 138240   ;;  %s707_s6 = smov 95  }
  0x18   :  { %v76_v12 = vmax.f32 %v74_v2, %v75_v6  ;;  %v90_v13 = vmax.f32 %v88_v3, %v89_v7  ;;  %v48_v14 = vadd.f32 %v47_v8, %v46_v4  ;;  %v62_v15 = vadd.f32 %v61_v9, %v60_v5  ;;  %s614_s22 = sld [smem:[#allocation2 + $0x10]]  ;;  %s708_s9 = smov 126  }
  0x19   :  { %v81_v16 = vsel %vm45_vm0, %v41_v10, -inf  ;;  %v95_v17 = vsel %vm45_vm0, %v42_v11, -inf  ;;  %v53_v18 = vsel %vm45_vm0, %v41_v10, 0.0  ;;  %v67_v19 = vsel %vm45_vm0, %v42_v11, 0.0  ;;  %s613_s23 = sld [smem:[#allocation2 + $0x7]]  ;;  %s709_s12 = smov 112  }
  0x1a   :  { %v77_v20 = vrot.slane %v76_v12, 2  ;;  %v91_v21 = vrot.slane %v90_v13, 2  ;;  %v49_v22 = vrot.slane %v48_v14, 2  ;;  %v63_v23 = vrot.slane %v62_v15, 2  ;;  %s604_s24 = sld [smem:[#allocation2 + $0xb]]  ;;  %s710_s13 = smov 110  }
  0x1b   :  { %v82_v24 = vrot.slane %v81_v16, 4  ;;  %v96_v25 = vrot.slane %v95_v17, 4  ;;  %v54_v26 = vrot.slane %v53_v18, 4  ;;  %v68_v27 = vrot.slane %v67_v19, 4  ;;  %s603_s25 = sld [smem:[#allocation2 + $0x2]]  ;;  %s711_s14 = smov 96  }
  0x1c   :  { %v78_v28 = vmax.f32 %v76_v12, %v77_v20  ;;  %v92_v29 = vmax.f32 %v90_v13, %v91_v21  ;;  %v50_v30 = vadd.f32 %v49_v22, %v48_v14  ;;  %v64_v31 = vadd.f32 %v63_v23, %v62_v15  ;;  %s769_s27 = sld [smem:[#allocation2 + $0xc]]  ;;  %s712_s15 = smov 94  }
  0x1d   :  { %v83_v32 = vmax.f32 %v81_v16, %v82_v24  ;;  %v97_v33 = vmax.f32 %v95_v17, %v96_v25  ;;  %v55_v34 = vadd.f32 %v54_v26, %v53_v18  ;;  %v69_v35 = vadd.f32 %v68_v27, %v67_v19  ;;  %s771_s28 = sld [smem:[#allocation2 + $0x3]]  ;;  %s714_s16 = smov [#allocation7]  }
  0x1e   :  { %v79_v36 = vrot.slane %v78_v28, 1  ;;  %v93_v37 = vrot.slane %v92_v29, 1  ;;  %v51_v38 = vrot.slane %v50_v30, 1  ;;  %v65_v39 = vrot.slane %v64_v31, 1  ;;  %s777_s29 = sld [smem:[#allocation2]]  ;;  %s587_s17 = sshll.u32 %s714_s16, 4  ;;  %s588_s17 = int_to_ptr.vmem [resolvable:$true] %s587_s17 }
  0x1f   :  { %v84_v40 = vrot.slane %v83_v32, 2  ;;  %v98_v41 = vrot.slane %v97_v33, 2  ;;  %v56_v42 = vrot.slane %v55_v34, 2  ;;  %v70_v43 = vrot.slane %v69_v35, 2  ;;  %s783_s30 = sld [smem:[#allocation2 + $0x9]]  ;;  %s674_s18 = scalar_lea.vmem %s588_s17, 64 }
  0x20   :  { %v80_v44 = vmax.f32 %v78_v28, %v79_v36  ;;  %v94_v45 = vmax.f32 %v92_v29, %v93_v37  ;;  %v52_v46 = vadd.f32 %v51_v38, %v50_v30  ;;  %v66_v47 = vadd.f32 %v65_v39, %v64_v31  ;;  %s792_s4 = sld [smem:[#allocation2 + $0xe]]  ;;  %p675_p5 = scmp.ne.s32.totalorder %s588_s17, %s674_s18 }
  0x21   :  { %v85_v48 = vmax.f32 %v83_v32, %v84_v40  ;;  %v99_v49 = vmax.f32 %v97_v33, %v98_v41  ;;  %v57_v50 = vadd.f32 %v56_v42, %v55_v34  ;;  %v71_v51 = vadd.f32 %v70_v43, %v69_v35  ;;  %s609_s5 = sld [smem:[#allocation2 + $0x5]]  ;;  %p679_p6 = scmp.lt.s32.totalorder %s588_s17, %s588_s17 }
  0x22   :  { %v124_v52 = vsel %vm106_vm1, %v94_v45, %v80_v44  ;;  %v107_v53 = vsel %vm106_vm1, %v66_v47, %v52_v46  ;;  %v751_v1 = vand.u32 127, %v136_v0  ;;  %v753_v2 = vstv %s602_s1  ;;  %s612_s7 = sld [smem:[#allocation2 + $0xf]]  ;;  %p680_p7 = scmp.lt.s32.totalorder %s674_s18, %s674_s18 }
  0x23   :  { %126 = vrot.lane.b32.xlu1 %v124_v52, %s704_s0  ;;  %109 = vrot.lane.b32.xlu0 %v107_v53, %s704_s0  ;;  %v86_v54 = vrot.slane %v85_v48, 1  ;;  %v100_v55 = vrot.slane %v99_v49, 1  ;;  %v58_v56 = vrot.slane %v57_v50, 1  ;;  %v72_v57 = vrot.slane %v71_v51, 1  ;;  %s611_s8 = sld [smem:[#allocation2 + $0x6]] }
  0x24   :  { %v755_v3 = vstv %s601_s19  ;;  %v140_v6 = vadd.s32 15, %v751_v1  ;;  %v138_v9 = vadd.s32 128, %v751_v1  ;;  %v763_v12 = vstv %s608_s20  ;;  %s616_s10 = sld [smem:[#allocation2 + $0x11]]  ;;  %p681_p8 = por %p680_p7, %p679_p6 }
  0x25   :  { %v87_v58 = vmax.f32 %v85_v48, %v86_v54  ;;  %v101_v59 = vmax.f32 %v99_v49, %v100_v55  ;;  %v59_v60 = vadd.f32 %v58_v56, %v57_v50  ;;  %v73_v61 = vadd.f32 %v72_v57, %v71_v51  ;;  %s615_s11 = sld [smem:[#allocation2 + $0x8]] }
  0x26   :  { %v765_v13 = vstv %s607_s21  ;;  %v147_v14 = vand.u32 15, %v140_v6  ;;  %v773_v15 = vadd.s32 15, %v138_v9  ;;  %v779_v18 = vstv %s614_s22  ;;  %p682_p9 = pnand %p681_p8, %p675_p5 }
  0x27   :  { %v125_v62 = vsel %vm106_vm1, %v101_v59, %v87_v58  ;;  %v108_v63 = vsel %vm106_vm1, %v73_v61, %v59_v60  ;;  %v781_v19 = vstv %s613_s23  ;;  %v794_v26 = vstv %s604_s24 }
  0x28   :  { %128 = vrot.lane.b32.xlu1 %v125_v62, %s704_s0  ;;  %111 = vrot.lane.b32.xlu0 %v108_v63, %s704_s0  ;;  %vm185_vm3 = vcmp.ge.s32.totalorder %v147_v14, 1  ;;  %v154_v20 = vand.u32 15, %v773_v15  ;;  %v796_v28 = vstv %s603_s25  ;;  %vm179_vm4 = vcmp.lt.s32.totalorder %v147_v14, 15 }
  0x29   :  { %v812_v33 = vstv %s769_s27  ;;  %v815_v34 = vstv %s771_s28  ;;  %v199_v37 = vstv %s777_s29  ;;  %v204_v38 = vstv %s783_s30 }
  0x2a   :  { %vm180_vm5 = vcmp.lt.s32.totalorder %v154_v20, 15  ;;  %v830_v45 = vstv %s792_s4  ;;  %v832_v46 = vstv %s609_s5  ;;  %v844_v53 = vstv %s612_s7 }
  0x2b   :  { %v846_v54 = vstv %s611_s8  ;;  %v852_v57 = vstv %s616_s10  ;;  %v854_v58 = vstv %s615_s11  ;;  %vm186_vm7 = vcmp.ge.s32.totalorder %v154_v20, 1 }
  0x2c   :  { %vm224_vm9 = vcmask 1039360   ;;  %vm265_vm10 = vcmask 1031168   ;;  %vm306_vm11 = vcmask 916480   ;;  %vm347_vm12 = vcmask 908288  }
  0x2d   :  { %vm388_vm13 = vcmask 900096   ;;  %vm429_vm14 = vcmask 785408   ;;  %vm470_vm15 = vcmask 777216   ;;  %vm511_vm0 = vcmask 769024  }
  0x2e   :  { %vm578_vm1 = vcmp.lt.s32.totalorder %v136_v0, 256 }
  0x95   :  { %v127_v4 = vpop.permute.xlu1 %126  ;;  %v110_v5 = vpop.permute.xlu0 %109 }
  0x96   :  { %v134_v7 = vsel %vm113_vm2, 0.0, %v127_v4  ;;  %v118_v8 = vsel %vm113_vm2, 0.0, %v110_v5 }
  0x97   :  { %v232_v10 = vmul.f32 %v753_v2, %v134_v7  ;;  %v212_v11 = vmul.f32 %v755_v3, %v118_v8  ;;  %v355_v16 = vmul.f32 %v763_v12, %v134_v7  ;;  %v335_v17 = vmul.f32 %v765_v13, %v118_v8 }
  0x98   :  { %v478_v23 = vmul.f32 %v779_v18, %v134_v7  ;;  %v458_v24 = vmul.f32 %v781_v19, %v118_v8  ;;  %v194_v25 = vsel %vm185_vm3, %v134_v7, 0.0  ;;  %v188_v27 = vsel %vm185_vm3, %v118_v8, 0.0 }
  0x99   :  { %238 = vrot.lane.b32.xlu1 %v232_v10, %s705_s26  ;;  %218 = vrot.lane.b32.xlu0 %v212_v11, %s705_s26  ;;  %v273_v31 = vmul.f32 %v794_v26, %v194_v25  ;;  %v253_v32 = vmul.f32 %v796_v28, %v188_v27  ;;  %v191_v35 = vsel %vm179_vm4, %v134_v7, 0.0  ;;  %v182_v36 = vsel %vm179_vm4, %v118_v8, 0.0 }
  0x9a   :  { %v788_v21 = vpop.permute.xlu1 %128  ;;  %v112_v22 = vpop.permute.xlu0 %111  ;;  %v314_v41 = vmul.f32 %v812_v33, %v191_v35  ;;  %v294_v42 = vmul.f32 %v815_v34, %v182_v36  ;;  %v200_v43 = vmul.f32 %v199_v37, %v182_v36  ;;  %v205_v44 = vmul.f32 %v204_v38, %v191_v35 }
  0x9b   :  { %v802_v29 = vsel %vm113_vm2, %v127_v4, %v788_v21  ;;  %v805_v30 = vsel %vm113_vm2, %v110_v5, %v112_v22  ;;  %v396_v51 = vmul.f32 %v830_v45, %v194_v25  ;;  %v376_v52 = vmul.f32 %v832_v46, %v188_v27 }
  0x9c   :  { %v822_v39 = vsel %vm180_vm5, %v805_v30, 0.0  ;;  %v825_v40 = vsel %vm180_vm5, %v802_v29, 0.0  ;;  %v838_v49 = vadd.f32 %v205_v44, %v200_v43  ;;  %v437_v55 = vmul.f32 %v844_v53, %v191_v35 }
  0x9d   :  { %361 = vrot.lane.b32.xlu1 %v355_v16, %s706_s3  ;;  %341 = vrot.lane.b32.xlu0 %v335_v17, %s706_s3  ;;  %v201_v47 = vmul.f32 %v199_v37, %v822_v39  ;;  %v206_v48 = vmul.f32 %v204_v38, %v825_v40  ;;  %v417_v56 = vmul.f32 %v846_v54, %v182_v36  ;;  %v119_v59 = vsel %vm113_vm2, %v112_v22, 0.0 }
  0x9e   :  { %v519_v60 = vmul.f32 %v852_v57, %v194_v25  ;;  %v499_v61 = vmul.f32 %v854_v58, %v188_v27  ;;  %v214_v62 = vmul.f32 %v755_v3, %v119_v59  ;;  %v135_v63 = vsel %vm113_vm2, %v788_v21, 0.0 }
  0x9f   :  { %v840_v50 = vadd.f32 %v206_v48, %v201_v47  ;;  %v213_v4 = vmul.f32 %v755_v3, %v805_v30  ;;  %v234_v5 = vmul.f32 %v753_v2, %v135_v63  ;;  %v233_v6 = vmul.f32 %v753_v2, %v802_v29 }
  0xa0   :  { %v139_v7 = vadd.s32 256, %v751_v1  ;;  %v337_v8 = vmul.f32 %v765_v13, %v119_v59  ;;  %v336_v3 = vmul.f32 %v765_v13, %v805_v30  ;;  %v356_v10 = vmul.f32 %v763_v12, %v802_v29 }
  0xa1   :  { %484 = vrot.lane.b32.xlu1 %v478_v23, %s707_s6  ;;  %464 = vrot.lane.b32.xlu0 %v458_v24, %s707_s6  ;;  %v357_v2 = vmul.f32 %v763_v12, %v135_v63  ;;  %v460_v11 = vmul.f32 %v781_v19, %v119_v59  ;;  %v459_v13 = vmul.f32 %v781_v19, %v805_v30  ;;  %v189_v17 = vsel %vm186_vm7, %v805_v30, 0.0 }
  0xa2   :  { %v142_v9 = vadd.s32 15, %v139_v7  ;;  %v479_v12 = vmul.f32 %v779_v18, %v802_v29  ;;  %v480_v14 = vmul.f32 %v779_v18, %v135_v63  ;;  %v254_v21 = vmul.f32 %v796_v28, %v189_v17 }
  0xa3   :  { %v195_v22 = vsel %vm186_vm7, %v802_v29, 0.0  ;;  %v295_v25 = vmul.f32 %v815_v34, %v822_v39  ;;  %v377_v30 = vmul.f32 %v832_v46, %v189_v17  ;;  %v438_v35 = vmul.f32 %v844_v53, %v825_v40 }
  0xa4   :  { %v161_v1 = vand.u32 15, %v142_v9  ;;  %v274_v18 = vmul.f32 %v794_v26, %v195_v22  ;;  %v500_v38 = vmul.f32 %v854_v58, %v189_v17 }
  0xa5   :  { %279 = vrot.lane.b32.xlu1 %v273_v31, %s708_s9  ;;  %259 = vrot.lane.b32.xlu0 %v253_v32, %s708_s9  ;;  %v397_v31 = vmul.f32 %v830_v45, %v195_v22 }
  0xa6   :  { %vm187_vm6 = vcmp.ge.s32.totalorder %v161_v1, 1  ;;  %vm181_vm8 = vcmp.lt.s32.totalorder %v161_v1, 15 }
  0xa7   :  { %v190_v16 = vsel %vm187_vm6, %v119_v59, 0.0  ;;  %v196_v15 = vsel %vm187_vm6, %v135_v63, 0.0  ;;  %v184_v23 = vsel %vm181_vm8, %v119_v59, 0.0  ;;  %v193_v27 = vsel %vm181_vm8, %v135_v63, 0.0 }
  0xa8   :  { %v255_v19 = vmul.f32 %v796_v28, %v190_v16  ;;  %v275_v20 = vmul.f32 %v794_v26, %v196_v15  ;;  %v296_v24 = vmul.f32 %v815_v34, %v184_v23  ;;  %v315_v28 = vmul.f32 %v812_v33, %v825_v40 }
  0xa9   :  { %320 = vrot.lane.b32.xlu1 %v314_v41, %s709_s12  ;;  %300 = vrot.lane.b32.xlu0 %v294_v42, %s709_s12  ;;  %v316_v26 = vmul.f32 %v812_v33, %v193_v27  ;;  %v378_v29 = vmul.f32 %v832_v46, %v190_v16  ;;  %v398_v32 = vmul.f32 %v830_v45, %v196_v15 }
  0xaa   :  { %v419_v33 = vmul.f32 %v846_v54, %v184_v23  ;;  %v418_v34 = vmul.f32 %v846_v54, %v822_v39  ;;  %v439_v36 = vmul.f32 %v844_v53, %v193_v27  ;;  %v501_v37 = vmul.f32 %v854_v58, %v190_v16 }
  0xab   :  { %v520_v39 = vmul.f32 %v852_v57, %v195_v22  ;;  %v521_v41 = vmul.f32 %v852_v57, %v196_v15 }
  0xad   :  { %402 = vrot.lane.b32.xlu1 %v396_v51, %s710_s13  ;;  %382 = vrot.lane.b32.xlu0 %v376_v52, %s710_s13 }
  0xb1   :  { %443 = vrot.lane.b32.xlu1 %v437_v55, %s711_s14  ;;  %423 = vrot.lane.b32.xlu0 %v417_v56, %s711_s14 }
  0xb5   :  { %525 = vrot.lane.b32.xlu1 %v519_v60, %s712_s15  ;;  %505 = vrot.lane.b32.xlu0 %v499_v61, %s712_s15 }
  0xb9   :  { %222 = vrot.lane.b32.xlu0 %v214_v62, %s705_s26  ;;  %220 = vrot.lane.b32.xlu1 %v213_v4, %s705_s26 }
  0xbd   :  { %240 = vrot.lane.b32.xlu0 %v233_v6, %s705_s26  ;;  %242 = vrot.lane.b32.xlu1 %v234_v5, %s705_s26 }
  0xc1   :  { %345 = vrot.lane.b32.xlu0 %v337_v8, %s706_s3  ;;  %343 = vrot.lane.b32.xlu1 %v336_v3, %s706_s3 }
  0xc5   :  { %363 = vrot.lane.b32.xlu0 %v356_v10, %s706_s3  ;;  %365 = vrot.lane.b32.xlu1 %v357_v2, %s706_s3 }
  0xc9   :  { %468 = vrot.lane.b32.xlu0 %v460_v11, %s707_s6  ;;  %466 = vrot.lane.b32.xlu1 %v459_v13, %s707_s6 }
  0xcd   :  { %486 = vrot.lane.b32.xlu0 %v479_v12, %s707_s6  ;;  %488 = vrot.lane.b32.xlu1 %v480_v14, %s707_s6 }
  0xd1   :  { %263 = vrot.lane.b32.xlu0 %v255_v19, %s708_s9  ;;  %261 = vrot.lane.b32.xlu1 %v254_v21, %s708_s9 }
  0xd5   :  { %281 = vrot.lane.b32.xlu0 %v274_v18, %s708_s9  ;;  %283 = vrot.lane.b32.xlu1 %v275_v20, %s708_s9 }
  0xd9   :  { %304 = vrot.lane.b32.xlu0 %v296_v24, %s709_s12  ;;  %302 = vrot.lane.b32.xlu1 %v295_v25, %s709_s12 }
  0xdd   :  { %322 = vrot.lane.b32.xlu0 %v315_v28, %s709_s12  ;;  %324 = vrot.lane.b32.xlu1 %v316_v26, %s709_s12 }
  0xe1   :  { %386 = vrot.lane.b32.xlu0 %v378_v29, %s710_s13  ;;  %384 = vrot.lane.b32.xlu1 %v377_v30, %s710_s13 }
  0xe5   :  { %404 = vrot.lane.b32.xlu0 %v397_v31, %s710_s13  ;;  %406 = vrot.lane.b32.xlu1 %v398_v32, %s710_s13 }
  0xe9   :  { %427 = vrot.lane.b32.xlu0 %v419_v33, %s711_s14  ;;  %425 = vrot.lane.b32.xlu1 %v418_v34, %s711_s14 }
  0xed   :  { %445 = vrot.lane.b32.xlu0 %v438_v35, %s711_s14  ;;  %447 = vrot.lane.b32.xlu1 %v439_v36, %s711_s14 }
  0xf1   :  { %509 = vrot.lane.b32.xlu0 %v501_v37, %s712_s15  ;;  %507 = vrot.lane.b32.xlu1 %v500_v38, %s712_s15 }
  0xf5   :  { %527 = vrot.lane.b32.xlu0 %v520_v39, %s712_s15  ;;  %529 = vrot.lane.b32.xlu1 %v521_v41, %s712_s15 }
 0x10b   :  { %v239_v40 = vpop.permute.xlu1 %238  ;;  %v219_v42 = vpop.permute.xlu0 %218 }
 0x10f   :  { %v944_v43 = vpop.permute.xlu1 %361  ;;  %v342_v44 = vpop.permute.xlu0 %341 }
 0x113   :  { %v946_v45 = vpop.permute.xlu1 %484  ;;  %v948_v46 = vpop.permute.xlu0 %464 }
 0x117   :  { %v280_v47 = vpop.permute.xlu1 %279  ;;  %v260_v48 = vpop.permute.xlu0 %259 }
 0x11b   :  { %v321_v51 = vpop.permute.xlu1 %320  ;;  %v301_v52 = vpop.permute.xlu0 %300 }
 0x11f   :  { %v950_v53 = vpop.permute.xlu1 %402  ;;  %v952_v54 = vpop.permute.xlu0 %382 }
 0x123   :  { %v954_v55 = vpop.permute.xlu1 %443  ;;  %v956_v56 = vpop.permute.xlu0 %423 }
 0x127   :  { %v958_v57 = vpop.permute.xlu1 %525  ;;  %v960_v58 = vpop.permute.xlu0 %505 }
 0x12b   :  { %v221_v59 = vpop.permute.xlu1 %220  ;;  %v223_v60 = vpop.permute.xlu0 %222 }
 0x12c   :  { %v225_v61 = vsel %vm224_vm9, %v219_v42, %v221_v59 }
 0x12d   :  { %v229_v62 = vadd.f32 %v225_v61, %v838_v49  ;;  %v226_v49 = vsel %vm224_vm9, %v221_v59, %v223_v60 }
 0x12e   :  { %v230_v16 = vadd.f32 %v226_v49, %v840_v50 }
 0x12f   :  { %v243_v63 = vpop.permute.xlu1 %242  ;;  %v241_v4 = vpop.permute.xlu0 %240 }
 0x130   :  { %v244_v5 = vsel %vm224_vm9, %v239_v40, %v241_v4  ;;  %v245_v14 = vsel %vm224_vm9, %v241_v4, %v243_v63 }
 0x131   :  { %v248_v6 = vadd.f32 %v244_v5, %v229_v62  ;;  %v249_v15 = vadd.f32 %v245_v14, %v230_v16 }
 0x133   :  { %v344_v7 = vpop.permute.xlu1 %343  ;;  %v346_v8 = vpop.permute.xlu0 %345 }
 0x134   :  { %v348_v38 = vsel %vm347_vm12, %v342_v44, %v344_v7  ;;  %v349_v39 = vsel %vm347_vm12, %v344_v7, %v346_v8 }
 0x137   :  { %v366_v3 = vpop.permute.xlu1 %365  ;;  %v364_v9 = vpop.permute.xlu0 %363 }
 0x13b   :  { %v965_v10 = vpop.permute.xlu1 %466  ;;  %v967_v2 = vpop.permute.xlu0 %468 }
 0x13f   :  { %v969_v1 = vpop.permute.xlu1 %488  ;;  %v971_v11 = vpop.permute.xlu0 %486 }
 0x143   :  { %v262_v13 = vpop.permute.xlu1 %261  ;;  %v264_v12 = vpop.permute.xlu0 %263 }
 0x144   :  { %v266_v21 = vsel %vm265_vm10, %v260_v48, %v262_v13  ;;  %v267_v22 = vsel %vm265_vm10, %v262_v13, %v264_v12  ;;  %v367_v48 = vsel %vm347_vm12, %v944_v43, %v364_v9 }
 0x145   :  { %v270_v23 = vadd.f32 %v266_v21, %v248_v6  ;;  %v271_v24 = vadd.f32 %v267_v22, %v249_v15 }
 0x147   :  { %v284_v17 = vpop.permute.xlu1 %283  ;;  %v282_v19 = vpop.permute.xlu0 %281 }
 0x148   :  { %v285_v18 = vsel %vm265_vm10, %v280_v47, %v282_v19  ;;  %v286_v20 = vsel %vm265_vm10, %v282_v19, %v284_v17 }
 0x149   :  { %v289_v29 = vadd.f32 %v285_v18, %v270_v23  ;;  %v290_v30 = vadd.f32 %v286_v20, %v271_v24  ;;  %v491_v23 = vsel %vm470_vm15, %v971_v11, %v969_v1 }
 0x14b   :  { %v303_v25 = vpop.permute.xlu1 %302  ;;  %v305_v27 = vpop.permute.xlu0 %304 }
 0x14c   :  { %v307_v28 = vsel %vm306_vm11, %v301_v52, %v303_v25  ;;  %v308_v26 = vsel %vm306_vm11, %v303_v25, %v305_v27  ;;  %v368_v52 = vsel %vm347_vm12, %v364_v9, %v366_v3 }
 0x14d   :  { %v311_v50 = vadd.f32 %v307_v28, %v289_v29  ;;  %v312_v31 = vadd.f32 %v308_v26, %v290_v30 }
 0x14f   :  { %v325_v32 = vpop.permute.xlu1 %324  ;;  %v323_v33 = vpop.permute.xlu0 %322 }
 0x150   :  { %v326_v34 = vsel %vm306_vm11, %v321_v51, %v323_v33  ;;  %v327_v35 = vsel %vm306_vm11, %v323_v33, %v325_v32 }
 0x151   :  { %v330_v36 = vadd.f32 %v326_v34, %v311_v50  ;;  %v331_v37 = vadd.f32 %v327_v35, %v312_v31 }
 0x153   :  { %v352_v41 = vadd.f32 %v348_v38, %v330_v36  ;;  %v353_v40 = vadd.f32 %v349_v39, %v331_v37  ;;  %v385_v42 = vpop.permute.xlu1 %384  ;;  %v387_v47 = vpop.permute.xlu0 %386  ;;  %v556_v37 = vshrl.u32 %v136_v0, 7 }
 0x154   :  { %v389_v62 = vsel %vm388_vm13, %v952_v54, %v385_v42  ;;  %v390_v63 = vsel %vm388_vm13, %v385_v42, %v387_v47 }
 0x155   :  { %v371_v59 = vadd.f32 %v367_v48, %v352_v41  ;;  %v372_v51 = vadd.f32 %v368_v52, %v353_v40 }
 0x157   :  { %v407_v60 = vpop.permute.xlu1 %406  ;;  %v405_v61 = vpop.permute.xlu0 %404  ;;  %v393_v44 = vadd.f32 %v389_v62, %v371_v59  ;;  %v394_v4 = vadd.f32 %v390_v63, %v372_v51 }
 0x158   :  { %v408_v5 = vsel %vm388_vm13, %v950_v53, %v405_v61  ;;  %v409_v6 = vsel %vm388_vm13, %v405_v61, %v407_v60  ;;  %v471_v53 = vsel %vm470_vm15, %v948_v46, %v965_v10 }
 0x159   :  { %v412_v3 = vadd.f32 %v408_v5, %v393_v44  ;;  %v413_v9 = vadd.f32 %v409_v6, %v394_v4 }
 0x15b   :  { %v426_v7 = vpop.permute.xlu1 %425  ;;  %v428_v8 = vpop.permute.xlu0 %427 }
 0x15c   :  { %v430_v43 = vsel %vm429_vm14, %v956_v56, %v426_v7  ;;  %v431_v13 = vsel %vm429_vm14, %v426_v7, %v428_v8  ;;  %v472_v56 = vsel %vm470_vm15, %v965_v10, %v967_v2 }
 0x15d   :  { %v434_v12 = vadd.f32 %v430_v43, %v412_v3  ;;  %v435_v49 = vadd.f32 %v431_v13, %v413_v9 }
 0x15f   :  { %v448_v14 = vpop.permute.xlu1 %447  ;;  %v446_v16 = vpop.permute.xlu0 %445 }
 0x160   :  { %v449_v54 = vsel %vm429_vm14, %v954_v55, %v446_v16  ;;  %v450_v17 = vsel %vm429_vm14, %v446_v16, %v448_v14  ;;  %v490_v55 = vsel %vm470_vm15, %v946_v45, %v971_v11 }
 0x161   :  { %v453_v19 = vadd.f32 %v449_v54, %v434_v12  ;;  %v454_v21 = vadd.f32 %v450_v17, %v435_v49 }
 0x163   :  { %v475_v22 = vadd.f32 %v471_v53, %v453_v19  ;;  %v476_v15 = vadd.f32 %v472_v56, %v454_v21  ;;  %v508_v18 = vpop.permute.xlu1 %507  ;;  %v510_v20 = vpop.permute.xlu0 %509 }
 0x164   :  { %v512_v46 = vsel %vm511_vm0, %v960_v58, %v508_v18  ;;  %v513_v27 = vsel %vm511_vm0, %v508_v18, %v510_v20  ;;  %v713_v58 = vmov 1966171168  }
 0x165   :  { %v494_v24 = vadd.f32 %v490_v55, %v475_v22  ;;  %v495_v25 = vadd.f32 %v491_v23, %v476_v15  ;;  %v553_v35 = vunpack.c.l.s4 %v713_v58 }
 0x167   :  { %v516_v28 = vadd.f32 %v512_v46, %v494_v24  ;;  %v517_v10 = vadd.f32 %v513_v27, %v495_v25  ;;  %v530_v2 = vpop.permute.xlu1 %529  ;;  %v528_v26 = vpop.permute.xlu0 %527  ;;  %v554_v36 = vunpack.c.0.s8 %v553_v35 }
 0x168   :  { %v531_v29 = vsel %vm511_vm0, %v958_v57, %v528_v26  ;;  %v532_v30 = vsel %vm511_vm0, %v528_v26, %v530_v2 }
 0x169   :  { %v535_v50 = vadd.f32 %v531_v29, %v516_v28  ;;  %v536_v31 = vadd.f32 %v532_v30, %v517_v10  ;;  %v557_v57 = vsub.s32 %v554_v36, %v556_v37 }
 0x16b   :  { %v617_v32 = vmul.f32 -1.442695, %v535_v50  ;;  %v618_v45 = vmul.f32 -1.442695, %v536_v31 }
 0x16d   :  { %638 = vpow2.f32 %v617_v32 }
 0x16e   :  { %640 = vpow2.f32 %v618_v45 }
 0x17a   :  { %v639_v33 = vpop.eup %638 }
 0x17b   :  { %v641_v1 = vpop.eup %640  ;;  %v543_v11 = vadd.f32 1.0, %v639_v33 }
 0x17c   :  { %v544_v34 = vadd.f32 1.0, %v641_v1 }
 0x17d   :  { %642 = vrcp.f32 %v543_v11 }
 0x17e   :  { %644 = vrcp.f32 %v544_v34 }
 0x18a   :  { %v643_v38 = vpop.eup %642 }
 0x18b   :  { %v645_v39 = vpop.eup %644 }
 0x18c   :  { %v551_v41 = vcombine.low %v643_v38, %v645_v39 }
 0x18e   :  { %v558_v40 = vrot.slane %v551_v41, %v557_v57 }
 0x190   :  { %v559_v42 = vcombine.high %v558_v40, %v558_v40  ;;  %v566_v47 = vrot.slane %v558_v40, %v557_v57 }
 0x192   :  { %v573_v48 = vrot.slane %v559_v42, %v557_v57  ;;  %580 = vst.msk [vmem:[#allocation7] sm:$0x3] %vm578_vm1, %v566_v47 }
 0x194   :  { %581 = vst.msk [vmem:[#allocation7 + $0x2] sm:$0x3] %vm578_vm1, %v573_v48 }
 0x195   :  { %685 = shalt.err (!%p682_p9)
}
 0x196   :  { %s715_s0 = smov 32   ;;  %s716_s1 = smov 2  }
 0x197   :  { %593 = dma.vmem_to_hbm [thread:$0]  %s588_s17, 64, %s1010_s2, [#allocation4], %s715_s0, %s715_s0, %s716_s1  }
 0x198   :  { %698 = dma.done.wait [#allocation4], 64  }
 0x199   :  { %699 = vsyncadd [#allocation4], 4294967232 }
 0x19a   :  { %597 = vsyncpa [#allocation3], 1 }
 0x19b   :  { %598 = vsyncpa [#allocation4], 1 }
 0x19c   :  { %599 = vsyncpa [#allocation5], 1 }

</bundles_post_ra>
